<compile_context>
chip_gen: v7x
topology: tpu7x:2x2x1
jax: 0.10.0
libtpu: 0.0.40
codegen_flags: <defaults>
</compile_context>

<pallas_src>
import jax
import jax.numpy as jnp
from jax.experimental import pallas as pl
from jax.experimental.pallas import tpu as pltpu

LANE = 128


def _gaussian_add_kernel(x_ref, n_ref, s_ref, o_ref):
    # x_ref: (B, C, r_tile, 128) image tile
    # n_ref: (B, 1, r_tile, 128) clipped noise tile (shared across channels)
    # s_ref: (1, C, 1, 1) per-channel scale 0.25*(c+1), f32
    sn = s_ref[...] * n_ref[...]                        # f32, broadcast over channels
    o_ref[...] = x_ref[...] + sn.astype(x_ref.dtype)    # add in input dtype (bf16-safe)


def gaussian_noise_forward(encode_image, cover_image, *, mean, sigma, noise_key):
    """Pallas implementation of Gaussian_Noise.forward.

    encode_image: (B, C, H, W) NCHW
    cover_image : any array, passed through unchanged
    noise_key   : jax.random key used for the (host-side) noise draw
    Returns [noised_encode_image, cover_image].
    """
    B, C, H, W = encode_image.shape
    dtype = encode_image.dtype
    itemsize = jnp.dtype(dtype).itemsize
    HW = H * W

    # Host/XLA-side noise generation, exactly like the reference (numpy on host).
    # TODO(synk): the numpy RNG stream of the PyTorch reference cannot be reproduced
    # bit-exactly; jax.random.normal draws from the same N(mean, sigma) distribution.
    noise = jnp.clip(
        float(mean) + float(sigma) * jax.random.normal(noise_key, (B, 1, H, W), jnp.float32),
        0.0, 1.0,
    )

    # Lane-dense 4D view: (B, C, R, 128); pad the flattened spatial dim if needed
    # so stores stay unmasked full-lane vst.
    HW_pad = pl.cdiv(HW, LANE) * LANE
    R = HW_pad // LANE
    x = encode_image.reshape(B, C, HW)
    n = noise.reshape(B, 1, HW)
    if HW_pad != HW:
        pad = HW_pad - HW
        x = jnp.pad(x, ((0, 0), (0, 0), (0, pad)))
        n = jnp.pad(n, ((0, 0), (0, 0), (0, pad)))
    x = x.reshape(B, C, R, LANE)
    n = n.reshape(B, 1, R, LANE)

    # Per-channel scale, built once at trace time.
    scale = (0.25 * (jnp.arange(C, dtype=jnp.float32) + 1.0)).reshape(1, C, 1, 1)

    # Block sizing: ~4 MiB of image per step. Double-buffered in + noise + out
    # (~18 MiB for f32) fits every generation (v7x: 64 MiB physical VMEM).
    target_x_bytes = 4 * 1024 * 1024
    bytes_per_row = max(B * C * LANE * itemsize, 1)
    if R >= 8:
        r_tile = max(8, min(R, (target_x_bytes // bytes_per_row) // 8 * 8))
        # Guarantee >=2 grid steps when possible so v7x's two TensorCores both get work.
        if pl.cdiv(R, r_tile) < 2 and R >= 16:
            r_tile = max(8, (R // 2) // 8 * 8)
    else:
        r_tile = R  # tiny image: single full-extent block (allowed when == full dim)
    num_tiles = pl.cdiv(R, r_tile)

    cost = pl.CostEstimate(
        flops=2 * B * C * HW_pad,                                    # mul + add per element
        transcendentals=0,
        bytes_accessed=2 * B * C * HW_pad * itemsize + B * HW_pad * 4,
    )

    out = pl.pallas_call(
        _gaussian_add_kernel,
        out_shape=jax.ShapeDtypeStruct((B, C, R, LANE), dtype),
        grid=(num_tiles,),
        in_specs=[
            pl.BlockSpec((B, C, r_tile, LANE), lambda t: (0, 0, t, 0)),
            pl.BlockSpec((B, 1, r_tile, LANE), lambda t: (0, 0, t, 0)),
            pl.BlockSpec((1, C, 1, 1), lambda t: (0, 0, 0, 0)),
        ],
        out_specs=pl.BlockSpec((B, C, r_tile, LANE), lambda t: (0, 0, t, 0)),
        compiler_params=pltpu.CompilerParams(
            dimension_semantics=("parallel",),
            vmem_limit_bytes=48 * 1024 * 1024,
        ),
        cost_estimate=cost,
    )(x, n, scale)

    out = out.reshape(B, C, HW_pad)[:, :, :HW].reshape(B, C, H, W)
    return [out, cover_image]


if __name__ == "__main__":
    key = jax.random.PRNGKey(0)
    k_img, k_cover, k_noise = jax.random.split(key, 3)

    B, C, H, W = 2, 4, 16, 16
    encode_image = jax.random.normal(k_img, (B, C, H, W), dtype=jnp.float32)
    cover_image = jax.random.normal(k_cover, (B, C, H, W), dtype=jnp.float32)
    mean, sigma = 0.0, 1.0

    noised, cover = gaussian_noise_forward(
        encode_image, cover_image, mean=mean, sigma=sigma, noise_key=k_noise
    )
    jax.block_until_ready(noised)
    jax.block_until_ready(cover)

    assert noised.shape == (B, C, H, W) and noised.dtype == encode_image.dtype

    # Reference with the identical noise stream (same key, same draw formula).
    noise_ref = jnp.clip(
        mean + sigma * jax.random.normal(k_noise, (B, 1, H, W), jnp.float32), 0.0, 1.0
    )
    scales = (0.25 * (jnp.arange(C, dtype=jnp.float32) + 1.0))[None, :, None, None]
    ref = encode_image + scales * noise_ref

    assert jnp.allclose(noised, ref, atol=1e-5), "per-channel noise accumulation mismatch"
    assert jnp.array_equal(cover, cover_image), "cover image must pass through"
    assert bool(jnp.all(noise_ref >= 0.0)) and bool(jnp.all(noise_ref <= 1.0))
    assert bool(jnp.any(jnp.abs(noised - encode_image) > 1e-3)), "noise looks degenerate"

    print("KERNEL_OK")
</pallas_src>

<mosaic_0001>
module attributes {stable_mosaic.version = 11 : i64} {
  func.func @_gaussian_add_kernel(%arg0: i32, %arg1: memref<2x4x2x128xf32, #tpu.memory_space<vmem>>, %arg2: memref<2x1x2x128xf32, #tpu.memory_space<vmem>>, %arg3: memref<1x4x1x1xf32, #tpu.memory_space<vmem>>, %arg4: memref<2x4x2x128xf32, #tpu.memory_space<vmem>>) attributes {dimension_semantics = [#tpu.dimension_semantics<parallel>], iteration_bounds = array<i64: 1>, scalar_prefetch = 0 : i64, scratch_operands = 0 : i64, tpu.core_type = #tpu.core_type<tc>, window_params = [{transform_indices = @transform_0, window_bounds = array<i64: 2, 4, 2, 128>}, {transform_indices = @transform_1, window_bounds = array<i64: 2, 1, 2, 128>}, {pipeline_mode = #tpu.pipeline_mode<synchronous>, transform_indices = @transform_2, window_bounds = array<i64: 1, 4, 1, 1>}, {transform_indices = @transform_3, window_bounds = array<i64: 2, 4, 2, 128>}]} {
    %c0 = arith.constant 0 : index
    %c0_0 = arith.constant 0 : index
    %c0_1 = arith.constant 0 : index
    %c0_2 = arith.constant 0 : index
    %0 = vector.load %arg3[%c0, %c0_0, %c0_1, %c0_2] : memref<1x4x1x1xf32, #tpu.memory_space<vmem>>, vector<1x4x1x1xf32>
    %c0_3 = arith.constant 0 : index
    %c0_4 = arith.constant 0 : index
    %c0_5 = arith.constant 0 : index
    %c0_6 = arith.constant 0 : index
    %1 = vector.load %arg2[%c0_3, %c0_4, %c0_5, %c0_6] : memref<2x1x2x128xf32, #tpu.memory_space<vmem>>, vector<2x1x2x128xf32>
    %2 = vector.broadcast %0 : vector<1x4x1x1xf32> to vector<2x4x2x128xf32>
    %3 = vector.broadcast %1 : vector<2x1x2x128xf32> to vector<2x4x2x128xf32>
    %4 = arith.mulf %2, %3 : vector<2x4x2x128xf32>
    %c0_7 = arith.constant 0 : index
    %c0_8 = arith.constant 0 : index
    %c0_9 = arith.constant 0 : index
    %c0_10 = arith.constant 0 : index
    %5 = vector.load %arg1[%c0_7, %c0_8, %c0_9, %c0_10] : memref<2x4x2x128xf32, #tpu.memory_space<vmem>>, vector<2x4x2x128xf32>
    %6 = arith.addf %5, %4 : vector<2x4x2x128xf32>
    %c0_11 = arith.constant 0 : index
    %c0_12 = arith.constant 0 : index
    %c0_13 = arith.constant 0 : index
    %c0_14 = arith.constant 0 : index
    %7 = vector.load %arg4[%c0_11, %c0_12, %c0_13, %c0_14] : memref<2x4x2x128xf32, #tpu.memory_space<vmem>>, vector<2x4x2x128xf32>
    tpu.vector_store %arg4[%c0_11, %c0_12, %c0_13, %c0_14], %6 {strides = array<i32>} : memref<2x4x2x128xf32, #tpu.memory_space<vmem>>, vector<2x4x2x128xf32>,
    return
  }
  func.func @transform_0(%arg0: i32) -> (i32, i32, i32, i32) {
    %c0_i32 = arith.constant 0 : i32
    %c0_i32_0 = arith.constant 0 : i32
    %c0_i32_1 = arith.constant 0 : i32
    %c0_i32_2 = arith.constant 0 : i32
    return %c0_i32, %c0_i32_0, %arg0, %c0_i32_1 : i32, i32, i32, i32
  }
  func.func @transform_1(%arg0: i32) -> (i32, i32, i32, i32) {
    %c0_i32 = arith.constant 0 : i32
    %c0_i32_0 = arith.constant 0 : i32
    %c0_i32_1 = arith.constant 0 : i32
    %c0_i32_2 = arith.constant 0 : i32
    return %c0_i32, %c0_i32_0, %arg0, %c0_i32_1 : i32, i32, i32, i32
  }
  func.func @transform_2(%arg0: i32) -> (i32, i32, i32, i32) {
    %c0_i32 = arith.constant 0 : i32
    %c0_i32_0 = arith.constant 0 : i32
    %c0_i32_1 = arith.constant 0 : i32
    %c0_i32_2 = arith.constant 0 : i32
    %c0_i32_3 = arith.constant 0 : i32
    return %c0_i32, %c0_i32_0, %c0_i32_1, %c0_i32_2 : i32, i32, i32, i32
  }
  func.func @transform_3(%arg0: i32) -> (i32, i32, i32, i32) {
    %c0_i32 = arith.constant 0 : i32
    %c0_i32_0 = arith.constant 0 : i32
    %c0_i32_1 = arith.constant 0 : i32
    %c0_i32_2 = arith.constant 0 : i32
    return %c0_i32, %c0_i32_0, %arg0, %c0_i32_1 : i32, i32, i32, i32
  }
}

</mosaic_0001>

<bundles_post_ra>
// kernel: tpu_custom_call.1
= control target key start
LH: loop header
LB: loop body
LE: loop exit
PB: predicated region body
PF: predicated region fallthrough
CT: control target
= control target key end

     0   :  { %8 = vsyncpa [#allocation3], 0  ;;  %s252_s0 = inlined_call_operand.hbm [shape: f32[2,4,2,128], index: 0, kind: input, shape index: {}]   ;;  %s253_s1 = inlined_call_operand.vmem [shape: f32[2,1,2,128], index: 1, kind: input, shape index: {}]   ;;  %s254_s2 = inlined_call_operand.vmem [shape: f32[1,4,1,1], index: 2, kind: input, shape index: {}]   ;;  %s255_s3 = inlined_call_operand.hbm [shape: f32[2,4,2,128], index: 3, kind: output, shape index: {}]  }
   0x1   :  { %9 = vsyncpa [#allocation4], 0  ;;  %s179_s12 = smov [#allocation2]   ;;  %s131_s16 = scalar_lea.hbm %s252_s0, 256 }
   0x2   :  { %s15_s13 = sshll.u32 %s179_s12, 4  ;;  %p132_p0 = scmp.ne.s32.totalorder %s252_s0, %s131_s16  ;;  %s16_s13 = int_to_ptr.vmem [resolvable:$true] %s15_s13 }
   0x3   :  { %p135_p1 = scmp.lt.u32.totalorder %s131_s16, %s252_s0 }
   0x5   :  { %p137_p2 = pnand %p135_p1, %p132_p0 }
   0x7   :  { %140 = shalt.err (!%p137_p2)
}
   0x8   :  { %s141_s21 = scalar_lea.vmem %s16_s13, 256  ;;  %p146_p4 = scmp.lt.s32.totalorder %s16_s13, %s16_s13 }
   0x9   :  { %p142_p3 = scmp.ne.s32.totalorder %s16_s13, %s141_s21  ;;  %p147_p5 = scmp.lt.s32.totalorder %s141_s21, %s141_s21 }
   0xb   :  { %p148_p6 = por %p147_p5, %p146_p4 }
   0xd   :  { %p149_p7 = pnand %p148_p6, %p142_p3 }
   0xf   :  { %152 = shalt.err (!%p149_p7)
}
  0x10   :  { %s180_s22 = smov 32   ;;  %s181_s23 = smov 2  }
  0x11   :  { %21 = dma.hbm_to_vmem [thread:$0]  %s252_s0, 256, %s16_s13, [#allocation3], %s180_s22, %s180_s22, %s181_s23  }
  0x12   :  { %175 = dma.done.wait [#allocation3], 256  }
  0x13   :  { %176 = vsyncadd [#allocation3], 4294967040  ;;  %v182_v0 = vmov 0   ;;  %v122_v1 = vld [vmem:[%s254_s2 + $0x2] ss:$0 sm:$0xff] }
  0x14   :  { %130 = vset.pattern.permute.xlu1 %v182_v0  ;;  %129 = vset.pattern.permute.xlu0 %v182_v0  ;;  %v120_v2 = vld [vmem:[%s254_s2] ss:$0 sm:$0xff]  ;;  %v123_v3 = vld [vmem:[%s254_s2 + $0x3] ss:$0 sm:$0xff]  ;;  %v121_v4 = vld [vmem:[%s254_s2 + $0x1] ss:$0 sm:$0xff] }
  0x15   :  { %64 = vperm.xlu1 %130, %v122_v1   ;;  %56 = vperm.xlu0 %129, %v120_v2   ;;  %v33_v5 = vld [vmem:[%s253_s1] sm:$0x3]  ;;  %v34_v6 = vld [vmem:[%s253_s1 + $0x2] sm:$0x3]  ;;  %v81_v7 = vld [vmem:[#allocation2 + $0x4] sm:$0x3] }
  0x16   :  { %v85_v8 = vld [vmem:[#allocation2 + $0xc] sm:$0x3]  ;;  %v79_v10 = vld [vmem:[#allocation2] sm:$0x3]  ;;  %v83_v11 = vld [vmem:[#allocation2 + $0x8] sm:$0x3] }
  0x17   :  { %v82_v21 = vld [vmem:[#allocation2 + $0x6] sm:$0x3]  ;;  %v86_v22 = vld [vmem:[#allocation2 + $0xe] sm:$0x3]  ;;  %v80_v24 = vld [vmem:[#allocation2 + $0x2] sm:$0x3] }
  0x18   :  { %v84_v25 = vld [vmem:[#allocation2 + $0xa] sm:$0x3]  ;;  %s183_s1 = smov [#allocation5]  }
  0x19   :  { %68 = vperm.xlu1 %130, %v123_v3   ;;  %60 = vperm.xlu0 %129, %v121_v4   ;;  %s108_s2 = sshll.u32 %s183_s1, 4  ;;  %s109_s2 = int_to_ptr.vmem [resolvable:$true] %s108_s2 }
  0x1a   :  { %s153_s10 = scalar_lea.vmem %s109_s2, 256  ;;  %p158_p9 = scmp.lt.s32.totalorder %s109_s2, %s109_s2 }
  0x1b   :  { %p154_p8 = scmp.ne.s32.totalorder %s109_s2, %s153_s10  ;;  %p159_p10 = scmp.lt.s32.totalorder %s153_s10, %s153_s10 }
  0x1d   :  { %p160_p11 = por %p159_p10, %p158_p9 }
  0x1f   :  { %p161_p12 = pnand %p160_p11, %p154_p8 }
  0x94   :  { %v65_v9 = vpop.permute.xlu1 %64  ;;  %v57_v12 = vpop.permute.xlu0 %56 }
  0x95   :  { %v73_v13 = vmul.f32 %v65_v9, %v33_v5  ;;  %v77_v14 = vmul.f32 %v65_v9, %v34_v6  ;;  %v71_v15 = vmul.f32 %v57_v12, %v33_v5  ;;  %v75_v16 = vmul.f32 %v57_v12, %v34_v6 }
  0x97   :  { %v89_v17 = vadd.f32 %v81_v7, %v73_v13  ;;  %v93_v18 = vadd.f32 %v85_v8, %v77_v14  ;;  %v87_v19 = vadd.f32 %v79_v10, %v71_v15  ;;  %v91_v20 = vadd.f32 %v83_v11, %v75_v16 }
  0x98   :  { %v69_v23 = vpop.permute.xlu1 %68  ;;  %v61_v26 = vpop.permute.xlu0 %60 }
  0x99   :  { %97 = vst [vmem:[#allocation5 + $0x4] sm:$0x3] %v89_v17  ;;  %101 = vst [vmem:[#allocation5 + $0xc] sm:$0x3] %v93_v18  ;;  %v74_v27 = vmul.f32 %v69_v23, %v33_v5  ;;  %v78_v28 = vmul.f32 %v69_v23, %v34_v6  ;;  %v72_v29 = vmul.f32 %v61_v26, %v33_v5 }
  0x9a   :  { %95 = vst [vmem:[#allocation5] sm:$0x3] %v87_v19  ;;  %99 = vst [vmem:[#allocation5 + $0x8] sm:$0x3] %v91_v20  ;;  %v76_v30 = vmul.f32 %v61_v26, %v34_v6 }
  0x9b   :  { %v90_v31 = vadd.f32 %v82_v21, %v74_v27  ;;  %v94_v32 = vadd.f32 %v86_v22, %v78_v28  ;;  %v88_v33 = vadd.f32 %v80_v24, %v72_v29 }
  0x9c   :  { %v92_v34 = vadd.f32 %v84_v25, %v76_v30 }
  0x9d   :  { %98 = vst [vmem:[#allocation5 + $0x6] sm:$0x3] %v90_v31  ;;  %102 = vst [vmem:[#allocation5 + $0xe] sm:$0x3] %v94_v32 }
  0x9e   :  { %96 = vst [vmem:[#allocation5 + $0x2] sm:$0x3] %v88_v33  ;;  %100 = vst [vmem:[#allocation5 + $0xa] sm:$0x3] %v92_v34 }
  0x9f   :  { %164 = shalt.err (!%p161_p12)
}
  0xa0   :  { %s165_s13 = scalar_lea.hbm %s255_s3, 256 }
  0xa1   :  { %p166_p13 = scmp.ne.s32.totalorder %s255_s3, %s165_s13  ;;  %p169_p0 = scmp.lt.u32.totalorder %s165_s13, %s255_s3 }
  0xa3   :  { %p171_p1 = pnand %p169_p0, %p166_p13 }
  0xa5   :  { %174 = shalt.err (!%p171_p1)
}
  0xa6   :  { %114 = dma.vmem_to_hbm [thread:$0]  %s109_s2, 256, %s255_s3, [#allocation4], %s180_s22, %s180_s22, %s181_s23  }
  0xa7   :  { %177 = dma.done.wait [#allocation4], 256  }
  0xa8   :  { %178 = vsyncadd [#allocation4], 4294967040 }
  0xa9   :  { %118 = vsyncpa [#allocation3], 1 }
  0xaa   :  { %119 = vsyncpa [#allocation4], 1 }

</bundles_post_ra>
